<compile_context>
chip_gen: v7x
topology: tpu7x:2x2x1
jax: 0.10.0
libtpu: 0.0.40
codegen_flags: <defaults>
</compile_context>

<pallas_src>
import functools

import numpy as np
import jax
import jax.numpy as jnp
from jax.experimental import pallas as pl
from jax.experimental.pallas import tpu as pltpu


def _spatial_dropout_kernel(mask_ref, x_ref, o_ref):
    # x_ref/o_ref: (TS, H) tile of one batch element; mask_ref: (1, H) f32
    # scale (0 or 1/keep_prob), constant along the sequence axis.
    x = x_ref[...].astype(jnp.float32)
    o_ref[...] = (x * mask_ref[...]).astype(o_ref.dtype)


def _choose_tile_rows(S, H, itemsize, target_bytes=2 * 1024 * 1024):
    """Largest sequence-tile (multiple of 8, or full S) within ~target_bytes."""
    if S * H * itemsize <= target_bytes:
        return S
    rows = target_bytes // max(1, H * itemsize)
    rows = max(8, (rows // 8) * 8)
    return min(rows, S)


def spatial_dropout(x, p, key, training=True):
    """Pallas TPU SpatialDropout.  x: (B, S, H); drops whole hidden channels."""
    if not training or p == 0.0:
        return x
    if p >= 1.0:
        return jnp.zeros_like(x)

    B, S, H = x.shape
    keep_prob = 1.0 - float(p)

    # Per-(batch, channel) mask, constant over the sequence axis.  Values are
    # 0.0 (dropped) or 1/keep_prob (kept), computed in f32.
    keep = jax.random.bernoulli(key, keep_prob, (B, 1, H))
    mask = keep.astype(jnp.float32) * jnp.float32(1.0 / keep_prob)  # (B, 1, H)

    TS = _choose_tile_rows(S, H, jnp.dtype(x.dtype).itemsize)
    grid = (B, pl.cdiv(S, TS))

    return pl.pallas_call(
        _spatial_dropout_kernel,
        out_shape=jax.ShapeDtypeStruct(x.shape, x.dtype),
        grid=grid,
        in_specs=[
            # (1, H) mask tile for batch b (same tile for every S-step).
            pl.BlockSpec((None, 1, H), lambda b, s: (b, 0, 0)),
            # (TS, H) data tile.
            pl.BlockSpec((None, TS, H), lambda b, s: (b, s, 0)),
        ],
        out_specs=pl.BlockSpec((None, TS, H), lambda b, s: (b, s, 0)),
        compiler_params=pltpu.CompilerParams(
            # No carried state (mask is a plain input) -> both axes parallel,
            # letting multi-TensorCore chips (v7x) shard the grid.
            dimension_semantics=("parallel", "parallel"),
            vmem_limit_bytes=32 * 1024 * 1024,
        ),
    )(mask, x)


if __name__ == "__main__":
    B, S, H = 2, 8, 32
    p = 0.5

    root = jax.random.PRNGKey(0)
    key_x, key_mask = jax.random.split(root)
    x = jax.random.normal(key_x, (B, S, H), dtype=jnp.float32)

    out = spatial_dropout(x, p=p, key=key_mask, training=True)
    out = jax.block_until_ready(out)

    # Sanity check: every (batch, channel) column is either entirely zero or
    # entirely equal to x / (1 - p)  (the Dropout2d "spatial" guarantee).
    out_np = np.asarray(out)
    x_np = np.asarray(x)
    keep_prob = 1.0 - p
    for b in range(B):
        for h in range(H):
            col = out_np[b, :, h]
            dropped = np.all(col == 0.0)
            scaled = np.allclose(col, x_np[b, :, h] / keep_prob,
                                 rtol=1e-5, atol=1e-6)
            assert dropped or scaled, \
                "column is neither fully dropped nor correctly scaled"

    # Eval / p=0 path returns the input untouched.
    out_eval = spatial_dropout(x, p=p, key=key_mask, training=False)
    assert np.allclose(np.asarray(out_eval), x_np)

    print("KERNEL_OK")
</pallas_src>

<mosaic_0001>
module attributes {stable_mosaic.version = 11 : i64} {
  func.func @_spatial_dropout_kernel(%arg0: i32, %arg1: i32, %arg2: memref<1x1x32xf32, #tpu.memory_space<vmem>>, %arg3: memref<1x8x32xf32, #tpu.memory_space<vmem>>, %arg4: memref<1x8x32xf32, #tpu.memory_space<vmem>>) attributes {dimension_semantics = [#tpu.dimension_semantics<parallel>, #tpu.dimension_semantics<parallel>], iteration_bounds = array<i64: 2, 1>, scalar_prefetch = 0 : i64, scratch_operands = 0 : i64, tpu.core_type = #tpu.core_type<tc>, window_params = [{transform_indices = @transform_0, window_bounds = array<i64: 1, 1, 32>}, {transform_indices = @transform_1, window_bounds = array<i64: 1, 8, 32>}, {transform_indices = @transform_2, window_bounds = array<i64: 1, 8, 32>}]} {
    %c0 = arith.constant 0 : index
    %c0_0 = arith.constant 0 : index
    %c0_1 = arith.constant 0 : index
    %0 = vector.load %arg3[%c0, %c0_0, %c0_1] : memref<1x8x32xf32, #tpu.memory_space<vmem>>, vector<1x8x32xf32>
    %1 = vector.shape_cast %0 : vector<1x8x32xf32> to vector<8x32xf32>
    %c0_2 = arith.constant 0 : index
    %c0_3 = arith.constant 0 : index
    %c0_4 = arith.constant 0 : index
    %2 = vector.load %arg2[%c0_2, %c0_3, %c0_4] : memref<1x1x32xf32, #tpu.memory_space<vmem>>, vector<1x1x32xf32>
    %3 = vector.shape_cast %2 : vector<1x1x32xf32> to vector<1x32xf32>
    %4 = vector.broadcast %3 : vector<1x32xf32> to vector<8x32xf32>
    %5 = arith.mulf %1, %4 : vector<8x32xf32>
    %c0_5 = arith.constant 0 : index
    %c0_6 = arith.constant 0 : index
    %c0_7 = arith.constant 0 : index
    %6 = vector.load %arg4[%c0_5, %c0_6, %c0_7] : memref<1x8x32xf32, #tpu.memory_space<vmem>>, vector<1x8x32xf32>
    %7 = vector.shape_cast %6 : vector<1x8x32xf32> to vector<8x32xf32>
    %8 = vector.shape_cast %5 : vector<8x32xf32> to vector<1x8x32xf32>
    tpu.vector_store %arg4[%c0_5, %c0_6, %c0_7], %8 {strides = array<i32>} : memref<1x8x32xf32, #tpu.memory_space<vmem>>, vector<1x8x32xf32>,
    return
  }
  func.func @transform_0(%arg0: i32, %arg1: i32) -> (i32, i32, i32) {
    %c0_i32 = arith.constant 0 : i32
    %c0_i32_0 = arith.constant 0 : i32
    %c0_i32_1 = arith.constant 0 : i32
    return %arg0, %c0_i32, %c0_i32_0 : i32, i32, i32
  }
  func.func @transform_1(%arg0: i32, %arg1: i32) -> (i32, i32, i32) {
    %c0_i32 = arith.constant 0 : i32
    %c0_i32_0 = arith.constant 0 : i32
    return %arg0, %arg1, %c0_i32 : i32, i32, i32
  }
  func.func @transform_2(%arg0: i32, %arg1: i32) -> (i32, i32, i32) {
    %c0_i32 = arith.constant 0 : i32
    %c0_i32_0 = arith.constant 0 : i32
    return %arg0, %arg1, %c0_i32 : i32, i32, i32
  }
}

</mosaic_0001>

<bundles_post_ra>
// kernel: tpu_custom_call.1
= control target key start
LH: loop header
LB: loop body
LE: loop exit
PB: predicated region body
PF: predicated region fallthrough
CT: control target
= control target key end

     0   :  { %7 = vsyncpa [#allocation3], 0  ;;  %s801_s0 = inlined_call_operand.hbm [shape: f32[2,1,32], index: 0, kind: input, shape index: {}]   ;;  %s802_s1 = inlined_call_operand.hbm [shape: f32[2,8,32], index: 1, kind: input, shape index: {}]   ;;  %s803_s2 = inlined_call_operand.hbm [shape: f32[2,8,32], index: 2, kind: output, shape index: {}]  }
   0x1   :  { %9 = vsyncpa [#allocation3 + $0x1], 0 }
   0x2   :  { %10 = vsyncpa [#allocation6], 0 }
   0x3   :  { %12 = vsyncpa [#allocation6 + $0x1], 0 }
   0x4   :  { %13 = vsyncpa [#allocation4], 0 }
   0x5   :  { %15 = vsyncpa [#allocation4 + $0x1], 0  ;;  %s584_s9 = smov 0   ;;  %s586_s10 = smov 0  }
   0x6   :  { %s588_s11 = smov 0   ;;  %s590_s12 = smov 0  }
   0x7   :  { %s592_s13 = smov 0   ;;  %s594_s14 = smov 0  }
   0x8 LB: > { %s336_s15 = sadd.s32 4294967295, %s564_s14   ;;  %s337_s16 = sadd.s32 4294967294, %s564_s14   ;;  %s564_s14 = sphi %s594_s14, %s21_s14   ;;  %s560_s13 = sphi %s592_s13, %s823_s13   ;;  %s556_s12 = sphi %s590_s12, %s822_s12   ;;  %s552_s11 = sphi %s588_s11, %s821_s11   ;;  %s548_s10 = sphi %s586_s10, %s820_s10   ;;  %s544_s9 = sphi %s584_s9, %s819_s9  }
   0x9   : > { %s33_s17 = sadd.s32 1, %s560_s13  ;;  %s40_s18 = sadd.s32 1, %s552_s11 }
   0xa   : > { %p35_p0 = scmp.ge.s32.totalorder %s33_s17, 2  ;;  %p47_p1 = scmp.ne.s32.totalorder %s552_s11, %s548_s10 }
   0xb   : > { %p48_p2 = scmp.eq.s32.totalorder %s564_s14, 0  ;;  %p53_p3 = scmp.ne.s32.totalorder %s548_s10, %s544_s9 }
   0xc   : > { %s825_s17 = smov (%p35_p0, %s33_s17), 0  ;;  %p54_p5 = scmp.eq.s32.totalorder %s336_s15, 0 }
   0xd   : > { %p625_p4 = por %p48_p2, %p47_p1  ;;  %s37_s20 = ssub.s32 %s560_s13, %s825_s17 }
   0xe   : > { %p107_p6 = scmp.eq.s32.totalorder %s336_s15, 1  ;;  %p38_p7 = scmp.eq.s32.totalorder %s37_s20, 0 }
   0xf   : > { %p631_p8 = por %p54_p5, %p53_p3  ;;  %p113_p10 = scmp.eq.s32.totalorder %s337_s16, 1 }
  0x10   : > { %p635_p9 = por %p107_p6, %p47_p1  ;;  %p368_p13 = scmp.lt.s32.totalorder %s564_s14, 2 }
  0x11   : > { %s807_s21 = scalar_select %p631_p8, 1, 0 }
  0x12   : > { %s808_s22 = scalar_select %p635_p9, 1, 0 }
  0x13   : > { %s640_s23 = scalar_select %p38_p7, %s552_s11, %s40_s18  }
  0x14   : > { %p642_p11 = por %p113_p10, %p53_p3  ;;  %s649_s25 = sand.u32 1, %s552_s11  }
  0x15   : > { %s340_s26 = sshll.u32 %s560_s13, 4  ;;  %s136_s27 = scalar_lea.vmem [#allocation2], %s649_s25 }
  0x16   : > { %s809_s24 = scalar_select %p642_p11, 1, 0 }
  0x17   : > { %s143_s28 = sshll.u32 %s136_s27, 4  ;;  %s656_s3 = scalar_lea.hbm %s801_s0, %s340_s26  ;;  %s658_s28 = int_to_ptr.vmem [resolvable:$true] %s143_s28 }
  0x18   : > { %p662_p0 = pnand %p368_p13, %p625_p4  ;;  %s341_s5 = sshll.u32 %s649_s25, 3 }
  0x19   : > { %s134_s6 = scalar_lea.sflag [#allocation3], %s649_s25  ;;  %s418_s7 = scalar_lea.hbm %s656_s3, 16 }
  0x1a   : > { %p419_p3 = scmp.ne.s32.totalorder %s656_s3, %s418_s7  ;;  %p420_p5 = pneg %p662_p0 }
  0x1b   : > { %s423_s16 = scalar_lea.hbm %s801_s0, 32  ;;  %p424_p4 = scmp.lt.u32.totalorder %s656_s3, %s801_s0 }
  0x1c   : > { %p421_p6 = pnand %p420_p5, %p419_p3  ;;  %p425_p10 = scmp.lt.u32.totalorder %s423_s16, %s418_s7 }
  0x1d   : > { %p427_p12 = scmp.lt.u32.totalorder %s418_s7, %s656_s3 }
  0x1e   : > { %p422_p7 = pneg %p421_p6  ;;  %p426_p13 = por %p425_p10, %p424_p4 }
  0x20   : > { %p428_p1 = por %p427_p12, %p426_p13 }
  0x22   : > { %p429_p2 = pnand %p428_p1, %p422_p7 }
  0x24   : > { %432 = shalt.err (!%p429_p2)
}
  0x25   : > { %s433_s20 = scalar_lea.vmem %s658_s28, 16  ;;  %s566_s26 = smov [#allocation2]  }
  0x26   : > { %p434_p3 = scmp.ne.s32.totalorder %s658_s28, %s433_s20  ;;  %s438_s27 = sshll.u32 %s566_s26, 4  ;;  %s439_s27 = int_to_ptr.vmem [resolvable:$false] %s438_s27 }
  0x27   : > { %s440_s29 = scalar_lea.vmem %s439_s27, 32  ;;  %p441_p9 = scmp.lt.s32.totalorder %s658_s28, %s439_s27 }
  0x28   : > { %p436_p6 = pnand %p434_p3, %p420_p5  ;;  %p442_p4 = scmp.lt.s32.totalorder %s440_s29, %s433_s20 }
  0x2a   : > { %p437_p11 = pneg %p436_p6  ;;  %p443_p10 = por %p442_p4, %p441_p9 }
  0x2c   : > { %p444_p12 = pnand %p443_p10, %p437_p11 }
  0x2e   : > { %447 = shalt.err (!%p444_p12)
}
  0x2f   : > { %360 = dma.hbm_to_vmem [thread:$0]  (!%p662_p0), %s656_s3, 16, %s658_s28, %s134_s6  }
  0x30   : > { %p811_p1 = scmp.lt.s32.totalorder %s564_s14, 3  ;;  %p812_p2 = scmp.ge.s32.totalorder %s564_s14, 1 }
  0x31   : > { %s342_s7 = sshll.u32 %s560_s13, 7  ;;  %s154_s8 = scalar_lea.vmem [#allocation5], %s341_s5 }
  0x32   : > { %p699_p7 = pnand %p812_p2, %p811_p1  ;;  %s162_s15 = sshll.u32 %s154_s8, 4  ;;  %s163_s15 = int_to_ptr.vmem [resolvable:$true] %s162_s15 }
  0x33   : > { %s709_s19 = scalar_lea.hbm %s802_s1, %s342_s7  ;;  %s151_s28 = scalar_lea.sflag [#allocation6], %s649_s25 }
  0x34   : > { %s813_s30 = scalar_select %p699_p7, 1, 0 }
  0x35   : > { %s448_s3 = scalar_lea.hbm %s709_s19, 128  ;;  %s453_s20 = scalar_lea.hbm %s802_s1, 256 }
  0x36   : > { %p449_p9 = scmp.ne.s32.totalorder %s709_s19, %s448_s3  ;;  %p454_p3 = scmp.lt.u32.totalorder %s709_s19, %s802_s1 }
  0x37   : > { %p455_p6 = scmp.lt.u32.totalorder %s453_s20, %s448_s3  ;;  %p457_p10 = scmp.lt.u32.totalorder %s448_s3, %s709_s19 }
  0x38   : > { %p451_p11 = pnand %p449_p9, %p420_p5 }
  0x39   : > { %p456_p4 = por %p455_p6, %p454_p3 }
  0x3a   : > { %p452_p13 = pneg %p451_p11 }
  0x3b   : > { %p458_p12 = por %p457_p10, %p456_p4 }
  0x3d   : > { %p459_p1 = pnand %p458_p12, %p452_p13 }
  0x3f   : > { %462 = shalt.err (!%p459_p1)
}
  0x40   : > { %s463_s25 = scalar_lea.vmem %s163_s15, 128  ;;  %s567_s29 = smov [#allocation5]  }
  0x41   : > { %p464_p2 = scmp.ne.s32.totalorder %s163_s15, %s463_s25  ;;  %s468_s7 = sshll.u32 %s567_s29, 4  ;;  %s469_s7 = int_to_ptr.vmem [resolvable:$false] %s468_s7 }
  0x42   : > { %s470_s8 = scalar_lea.vmem %s469_s7, 256  ;;  %p471_p8 = scmp.lt.s32.totalorder %s163_s15, %s469_s7 }
  0x43   : > { %p466_p9 = pnand %p464_p2, %p420_p5  ;;  %p472_p7 = scmp.lt.s32.totalorder %s470_s8, %s463_s25 }
  0x45   : > { %p467_p11 = pneg %p466_p9  ;;  %p473_p3 = por %p472_p7, %p471_p8 }
  0x47   : > { %p474_p6 = pnand %p473_p3, %p467_p11 }
  0x49   : > { %477 = shalt.err (!%p474_p6)
}
  0x4a   : > { %363 = dma.hbm_to_vmem [thread:$0]  (!%p662_p0), %s709_s19, 128, %s163_s15, %s151_s28  }
  0x4b   : > { %p814_p13 = scmp.ne.s32.totalorder %s813_s30, 0 }
  0x4c   : > { %s734_s16 = sand.u32 (!%p814_p13), 1, %s548_s10   ;;  %p815_p5 = scmp.ne.s32.totalorder (!%p814_p13), %s807_s21, 0 }
  0x4d   : > { %171 = sbr.rel (%p814_p13) target bundleno = 114 (0x72), region = 28  ;;  %s174_s18 = scalar_lea.sflag (!%p814_p13), [#allocation3], %s734_s16 }
  0x4e   : > { %s176_s3 = scalar_lea.vmem (!%p814_p13), [#allocation2], %s734_s16 }
  0x54   : > { %531 = dma.done.wait (%p815_p5), %s174_s18, 16  }
  0x55   : > { %533 = vsyncadd (%p815_p5), %s174_s18, 4294967280  ;;  %s344_s4 = sshll.u32 %s734_s16, 3  ;;  %s182_s15 = scalar_lea.sflag [#allocation6], %s734_s16 }
  0x56   : > { %s185_s30 = scalar_lea.vmem [#allocation5], %s344_s4 }
  0x57   : > { %535 = dma.done.wait (%p815_p5), %s182_s15, 128  }
  0x58   : > { %537 = vsyncadd (%p815_p5), %s182_s15, 4294967168  ;;  %s209_s19 = scalar_lea.vmem [#allocation7], %s344_s4  ;;  %s348_s6 = sshll.u32 %s556_s12, 7  ;;  %v210_v0 = vld [vmem:[%s185_s30] sm:$0xff]  ;;  %v346_v1 = vld [vmem:[%s176_s3] ss:$0 sm:$0xff] }
  0x59   : > { %s236_s28 = sshll.u32 %s209_s19, 4  ;;  %vm219_vm0 = vcmask 261120   ;;  %v218_v2 = vmul.f32 %v346_v1, %v210_v0  ;;  %s754_s21 = scalar_lea.hbm %s803_s2, %s348_s6  ;;  %s749_s28 = int_to_ptr.vmem [resolvable:$true] %s236_s28 }
  0x5a   : > { %s222_s26 = scalar_lea.sflag [#allocation4], %s734_s16  ;;  %s478_s27 = scalar_lea.vmem %s749_s28, 128 }
  0x5b   : > { %220 = vst.msk [vmem:[%s209_s19] sm:$0xff] %vm219_vm0, %v218_v2  ;;  %p479_p8 = scmp.ne.s32.totalorder %s749_s28, %s478_s27  ;;  %p816_p0 = scmp.ne.s32.totalorder %s808_s22, 0 }
  0x5c   : > { %s568_s12 = smov [#allocation7]  }
  0x5d   : > { %p480_p7 = pnand %p479_p8, %p816_p0  ;;  %s482_s25 = sshll.u32 %s568_s12, 4  ;;  %s483_s25 = int_to_ptr.vmem [resolvable:$false] %s482_s25 }
  0x5e   : > { %s484_s29 = scalar_lea.vmem %s483_s25, 256  ;;  %p485_p10 = scmp.lt.s32.totalorder %s749_s28, %s483_s25 }
  0x5f   : > { %p481_p4 = pneg %p480_p7  ;;  %p486_p12 = scmp.lt.s32.totalorder %s484_s29, %s478_s27 }
  0x61   : > { %p487_p1 = por %p486_p12, %p485_p10 }
  0x63   : > { %p488_p2 = pnand %p487_p1, %p481_p4 }
  0x65   : > { %491 = shalt.err (!%p488_p2)
}
  0x66   : > { %s492_s7 = scalar_lea.hbm %s754_s21, 128  ;;  %s496_s18 = scalar_lea.hbm %s803_s2, 256 }
  0x67   : > { %p493_p9 = scmp.ne.s32.totalorder %s754_s21, %s492_s7  ;;  %p497_p6 = scmp.lt.u32.totalorder %s754_s21, %s803_s2 }
  0x68   : > { %p498_p13 = scmp.lt.u32.totalorder %s496_s18, %s492_s7  ;;  %p500_p8 = scmp.lt.u32.totalorder %s492_s7, %s754_s21 }
  0x69   : > { %p494_p11 = pnand %p493_p9, %p816_p0 }
  0x6a   : > { %p499_p5 = por %p498_p13, %p497_p6 }
  0x6b   : > { %p495_p3 = pneg %p494_p11 }
  0x6c   : > { %p501_p7 = por %p500_p8, %p499_p5 }
  0x6e   : > { %p502_p4 = pnand %p501_p7, %p495_p3 }
  0x70   : > { %505 = shalt.err (!%p502_p4)
}
  0x71   : > { %355 = dma.vmem_to_hbm [thread:$0]  (%p816_p0), %s749_s28, 128, %s754_s21, %s222_s26  }
  0x72 PF: > { %s248_s15 = sand.u32 1, %s544_s9   ;;  %p817_p10 = scmp.ne.s32.totalorder %s809_s24, 0 }
  0x73   : > { %p818_p12 = scmp.ge.s32.totalorder %s564_s14, 2  ;;  %s249_s30 = scalar_lea.sflag [#allocation4], %s248_s15 }
  0x75   : > { %p365_p1 = pnand %p818_p12, %p817_p10 }
  0x77   : > { %539 = dma.done.wait (!%p365_p1), %s249_s30, 128  }
  0x78   : > { %541 = vsyncadd (!%p365_p1), %s249_s30, 4294967168  ;;  %s21_s14 = sadd.s32 1, %s564_s14   ;;  %s819_s9 = smov %s548_s10 }
  0x79   : > { %p18_p2 = scmp.ge.s32.totalorder %s21_s14, 4   ;;  %s820_s10 = smov %s552_s11 }
  0x7a   : > { %s821_s11 = smov %s640_s23  ;;  %s822_s12 = smov %s560_s13 }
  0x7b   : > { %s823_s13 = smov %s825_s17  ;;  %20 = sbr.rel (!%p18_p2) target bundleno = 8 (0x8), region = 86 }
  0x82   :  { %254 = vsyncpa [#allocation3], 1 }
  0x83   :  { %256 = vsyncpa [#allocation3 + $0x1], 1 }
  0x84   :  { %257 = vsyncpa [#allocation6], 1 }
  0x85   :  { %259 = vsyncpa [#allocation6 + $0x1], 1 }
  0x86   :  { %260 = vsyncpa [#allocation4], 1 }
  0x87   :  { %262 = vsyncpa [#allocation4 + $0x1], 1 }

</bundles_post_ra>
